<compile_context>
chip_gen: v7x
topology: tpu7x:2x2x1
jax: 0.10.0
libtpu: 0.0.40
codegen_flags: <defaults>
</compile_context>

<pallas_src>
import jax
import jax.numpy as jnp
from jax.experimental import pallas as pl
from jax.experimental.pallas import tpu as pltpu

NUM_LAYERS = 2      # two stacked skip-connection blocks (resnet50-style layer)
SPATIAL_TILE = 512  # lanes per grid step (clamped / 128-aligned in the wrapper)


def _make_resnet_middle_kernel(num_layers: int):
    def kernel(x_ref, w_ref, b_ref, o_ref):
        # x_ref: (1, C, TS)   NCHW tile, spatial on the lane axis
        # w_ref: (L, C_out, C_in)  conv1x1 weights (grid-invariant, VMEM-resident)
        # b_ref: (L, C_out, 1)     conv1x1 biases, pre-shaped to broadcast over lanes
        in_dtype = x_ref.dtype
        acc = x_ref[0].astype(jnp.float32)            # (C, TS) f32 running activation
        for l in range(num_layers):                   # small static loop, fully unrolled
            conv = jnp.dot(w_ref[l], acc.astype(in_dtype),
                           preferred_element_type=jnp.float32)   # (C_out, TS)
            acc = jnp.maximum(acc + conv + b_ref[l].astype(jnp.float32), 0.0)
        o_ref[0] = acc.astype(o_ref.dtype)
    return kernel


def resnet_middle_forward(x_nchw, weights, biases, tile_s: int = SPATIAL_TILE):
    """x_nchw: (B, C, H, W); weights: (L, C_out, C_in); biases: (L, C_out)."""
    B, C, H, W = x_nchw.shape
    L = weights.shape[0]
    S = H * W

    # NCHW -> (B, C, S): pure reshape, no data movement.
    x = x_nchw.reshape(B, C, S)

    # 128-aligned spatial tile, clamped to the (padded) spatial extent.
    tile_s = min(tile_s, pl.cdiv(S, 128) * 128)
    n_s = pl.cdiv(S, tile_s)
    s_pad = n_s * tile_s
    if s_pad != S:
        # Tail handling: pad only when needed. Padded columns compute garbage
        # (bias + ReLU on zeros) that is sliced off below; 1x1 convs are
        # pointwise along spatial so they never contaminate valid columns.
        x = jnp.pad(x, ((0, 0), (0, 0), (0, s_pad - S)))

    b3 = biases.reshape(L, C, 1)  # broadcast-ready over the lane (spatial) axis

    kernel = _make_resnet_middle_kernel(L)

    out = pl.pallas_call(
        kernel,
        out_shape=jax.ShapeDtypeStruct((B, C, s_pad), x.dtype),
        grid_spec=pltpu.PrefetchScalarGridSpec(
            num_scalar_prefetch=0,
            grid=(B, n_s),
            in_specs=[
                pl.BlockSpec((1, C, tile_s), lambda b, s: (b, 0, s)),
                pl.BlockSpec((L, C, C), lambda b, s: (0, 0, 0)),   # grid-invariant
                pl.BlockSpec((L, C, 1), lambda b, s: (0, 0, 0)),   # grid-invariant
            ],
            out_specs=pl.BlockSpec((1, C, tile_s), lambda b, s: (b, 0, s)),
        ),
        compiler_params=pltpu.CompilerParams(
            dimension_semantics=("parallel", "parallel"),
        ),
    )(x, weights, b3)

    if s_pad != S:
        out = out[:, :, :S]
    return out.reshape(B, C, H, W)


if __name__ == "__main__":
    B, C, H, W = 2, 4, 16, 16

    key = jax.random.PRNGKey(0)
    kx, kw, kb = jax.random.split(key, 3)

    x = jax.random.normal(kx, (B, C, H, W), dtype=jnp.float32)
    # Deterministic synthetic conv1x1 parameters (per block), W[l, c_out, c_in].
    weights = 0.1 * jax.random.normal(kw, (NUM_LAYERS, C, C), dtype=jnp.float32)
    biases = 0.01 * jax.random.normal(kb, (NUM_LAYERS, C), dtype=jnp.float32)

    out = resnet_middle_forward(x, weights, biases)
    out = jax.block_until_ready(out)

    # Pure-JAX reference check of the same semantics (NCHW, 1x1 conv residual blocks).
    ref = x
    for l in range(NUM_LAYERS):
        conv = jnp.einsum('oc,bchw->bohw', weights[l], ref) \
               + biases[l][None, :, None, None]
        ref = jnp.maximum(ref + conv, 0.0)
    assert jnp.allclose(out, ref, atol=1e-5), "mismatch vs reference"

    print("KERNEL_OK")
</pallas_src>

<mosaic_0001>
module attributes {stable_mosaic.version = 11 : i64} {
  func.func @kernel(%arg0: i32, %arg1: i32, %arg2: memref<1x4x256xf32, #tpu.memory_space<vmem>>, %arg3: memref<2x4x4xf32, #tpu.memory_space<vmem>>, %arg4: memref<2x4x1xf32, #tpu.memory_space<vmem>>, %arg5: memref<1x4x256xf32, #tpu.memory_space<vmem>>) attributes {dimension_semantics = [#tpu.dimension_semantics<parallel>, #tpu.dimension_semantics<parallel>], iteration_bounds = array<i64: 2, 1>, scalar_prefetch = 0 : i64, scratch_operands = 0 : i64, tpu.core_type = #tpu.core_type<tc>, window_params = [{transform_indices = @transform_0, window_bounds = array<i64: 1, 4, 256>}, {pipeline_mode = #tpu.pipeline_mode<synchronous>, transform_indices = @transform_1, window_bounds = array<i64: 2, 4, 4>}, {pipeline_mode = #tpu.pipeline_mode<synchronous>, transform_indices = @transform_2, window_bounds = array<i64: 2, 4, 1>}, {transform_indices = @transform_3, window_bounds = array<i64: 1, 4, 256>}]} {
    %c0 = arith.constant 0 : index
    %c0_0 = arith.constant 0 : index
    %c0_1 = arith.constant 0 : index
    %0 = vector.load %arg2[%c0, %c0_0, %c0_1] : memref<1x4x256xf32, #tpu.memory_space<vmem>>, vector<1x4x256xf32>
    %1 = vector.shape_cast %0 : vector<1x4x256xf32> to vector<4x256xf32>
    %c0_2 = arith.constant 0 : index
    %c0_3 = arith.constant 0 : index
    %c0_4 = arith.constant 0 : index
    %2 = vector.load %arg3[%c0_2, %c0_3, %c0_4] : memref<2x4x4xf32, #tpu.memory_space<vmem>>, vector<1x4x4xf32>
    %3 = vector.shape_cast %2 : vector<1x4x4xf32> to vector<4x4xf32>
    %cst = arith.constant dense<0.000000e+00> : vector<4x256xf32>
    %4 = tpu.matmul %3, %1, %cst {dimension_numbers = #tpu.dot_dimension_numbers<[1], [0], [0], [1], [0, 0, 1, 1], [], []>} : vector<4x4xf32>, vector<4x256xf32>, vector<4x256xf32> -> vector<4x256xf32>
    %5 = arith.addf %1, %4 : vector<4x256xf32>
    %c0_5 = arith.constant 0 : index
    %c0_6 = arith.constant 0 : index
    %c0_7 = arith.constant 0 : index
    %6 = vector.load %arg4[%c0_5, %c0_6, %c0_7] : memref<2x4x1xf32, #tpu.memory_space<vmem>>, vector<1x4x1xf32>
    %7 = vector.shape_cast %6 : vector<1x4x1xf32> to vector<4x1xf32>
    %8 = vector.broadcast %7 : vector<4x1xf32> to vector<4x256xf32>
    %9 = arith.addf %5, %8 : vector<4x256xf32>
    %cst_8 = arith.constant 0.000000e+00 : f32
    %10 = vector.broadcast %cst_8 : f32 to vector<4x256xf32>
    %11 = arith.maximumf %9, %10 : vector<4x256xf32>
    %c1 = arith.constant 1 : index
    %c0_9 = arith.constant 0 : index
    %c0_10 = arith.constant 0 : index
    %12 = vector.load %arg3[%c1, %c0_9, %c0_10] : memref<2x4x4xf32, #tpu.memory_space<vmem>>, vector<1x4x4xf32>
    %13 = vector.shape_cast %12 : vector<1x4x4xf32> to vector<4x4xf32>
    %cst_11 = arith.constant dense<0.000000e+00> : vector<4x256xf32>
    %14 = tpu.matmul %13, %11, %cst_11 {dimension_numbers = #tpu.dot_dimension_numbers<[1], [0], [0], [1], [0, 0, 1, 1], [], []>} : vector<4x4xf32>, vector<4x256xf32>, vector<4x256xf32> -> vector<4x256xf32>
    %15 = arith.addf %11, %14 : vector<4x256xf32>
    %c1_12 = arith.constant 1 : index
    %c0_13 = arith.constant 0 : index
    %c0_14 = arith.constant 0 : index
    %16 = vector.load %arg4[%c1_12, %c0_13, %c0_14] : memref<2x4x1xf32, #tpu.memory_space<vmem>>, vector<1x4x1xf32>
    %17 = vector.shape_cast %16 : vector<1x4x1xf32> to vector<4x1xf32>
    %18 = vector.broadcast %17 : vector<4x1xf32> to vector<4x256xf32>
    %19 = arith.addf %15, %18 : vector<4x256xf32>
    %cst_15 = arith.constant 0.000000e+00 : f32
    %20 = vector.broadcast %cst_15 : f32 to vector<4x256xf32>
    %21 = arith.maximumf %19, %20 : vector<4x256xf32>
    %c0_16 = arith.constant 0 : index
    %c0_17 = arith.constant 0 : index
    %c0_18 = arith.constant 0 : index
    %22 = vector.load %arg5[%c0_16, %c0_17, %c0_18] : memref<1x4x256xf32, #tpu.memory_space<vmem>>, vector<1x4x256xf32>
    %23 = vector.shape_cast %22 : vector<1x4x256xf32> to vector<4x256xf32>
    %24 = vector.shape_cast %21 : vector<4x256xf32> to vector<1x4x256xf32>
    tpu.vector_store %arg5[%c0_16, %c0_17, %c0_18], %24 {strides = array<i32>} : memref<1x4x256xf32, #tpu.memory_space<vmem>>, vector<1x4x256xf32>,
    return
  }
  func.func @transform_0(%arg0: i32, %arg1: i32) -> (i32, i32, i32) {
    %c0_i32 = arith.constant 0 : i32
    %c0_i32_0 = arith.constant 0 : i32
    return %arg0, %c0_i32, %arg1 : i32, i32, i32
  }
  func.func @transform_1(%arg0: i32, %arg1: i32) -> (i32, i32, i32) {
    %c0_i32 = arith.constant 0 : i32
    %c0_i32_0 = arith.constant 0 : i32
    %c0_i32_1 = arith.constant 0 : i32
    %c0_i32_2 = arith.constant 0 : i32
    return %c0_i32, %c0_i32_0, %c0_i32_1 : i32, i32, i32
  }
  func.func @transform_2(%arg0: i32, %arg1: i32) -> (i32, i32, i32) {
    %c0_i32 = arith.constant 0 : i32
    %c0_i32_0 = arith.constant 0 : i32
    %c0_i32_1 = arith.constant 0 : i32
    %c0_i32_2 = arith.constant 0 : i32
    return %c0_i32, %c0_i32_0, %c0_i32_1 : i32, i32, i32
  }
  func.func @transform_3(%arg0: i32, %arg1: i32) -> (i32, i32, i32) {
    %c0_i32 = arith.constant 0 : i32
    %c0_i32_0 = arith.constant 0 : i32
    return %arg0, %c0_i32, %arg1 : i32, i32, i32
  }
}

</mosaic_0001>

<bundles_post_ra>
// kernel: tpu_custom_call.1
= control target key start
LH: loop header
LB: loop body
LE: loop exit
PB: predicated region body
PF: predicated region fallthrough
CT: control target
= control target key end

     0   :  { %8 = vsyncpa [#allocation3], 0  ;;  %s941_s0 = inlined_call_operand.hbm [shape: f32[2,4,256], index: 0, kind: input, shape index: {}]   ;;  %s942_s1 = inlined_call_operand.vmem [shape: f32[2,4,4], index: 1, kind: input, shape index: {}]   ;;  %s943_s2 = inlined_call_operand.vmem [shape: f32[2,4,1], index: 2, kind: input, shape index: {}]   ;;  %s944_s3 = inlined_call_operand.hbm [shape: f32[2,4,256], index: 3, kind: output, shape index: {}]  }
   0x1   :  { %10 = vsyncpa [#allocation3 + $0x1], 0 }
   0x2   :  { %11 = vsyncpa [#allocation4], 0 }
   0x3   :  { %13 = vsyncpa [#allocation4 + $0x1], 0  ;;  %s747_s12 = smov 0   ;;  %s749_s13 = smov 0  }
   0x4   :  { %s751_s14 = smov 0   ;;  %s753_s15 = smov 0  }
   0x5   :  { %s755_s16 = smov 0   ;;  %s757_s17 = smov 0  }
   0x6 LB: > { %s516_s18 = sadd.s32 4294967295, %s720_s17   ;;  %s517_s19 = sadd.s32 4294967294, %s720_s17   ;;  %s720_s17 = sphi %s757_s17, %s19_s17   ;;  %s716_s16 = sphi %s755_s16, %s960_s16   ;;  %s712_s15 = sphi %s753_s15, %s959_s15   ;;  %s708_s14 = sphi %s751_s14, %s958_s14   ;;  %s704_s13 = sphi %s749_s13, %s957_s13   ;;  %s700_s12 = sphi %s747_s12, %s956_s12  }
   0x7   : > { %s31_s20 = sadd.s32 1, %s716_s16  ;;  %s40_s21 = sadd.s32 1, %s708_s14 }
   0x8   : > { %p33_p0 = scmp.ge.s32.totalorder %s31_s20, 2  ;;  %p47_p1 = scmp.ne.s32.totalorder %s708_s14, %s704_s13 }
   0x9   : > { %p48_p2 = scmp.eq.s32.totalorder %s720_s17, 0  ;;  %p53_p3 = scmp.ne.s32.totalorder %s704_s13, %s700_s12 }
   0xa   : > { %s962_s20 = smov (%p33_p0, %s31_s20), 0  ;;  %p54_p5 = scmp.eq.s32.totalorder %s516_s18, 0 }
   0xb   : > { %p788_p4 = por %p48_p2, %p47_p1  ;;  %s35_s23 = ssub.s32 %s716_s16, %s962_s20 }
   0xc   : > { %p121_p6 = scmp.eq.s32.totalorder %s516_s18, 1  ;;  %p38_p7 = scmp.eq.s32.totalorder %s35_s23, 0 }
   0xd   : > { %p794_p8 = por %p54_p5, %p53_p3  ;;  %p127_p10 = scmp.eq.s32.totalorder %s517_s19, 1 }
   0xe   : > { %p798_p9 = por %p121_p6, %p47_p1  ;;  %p553_p13 = scmp.lt.s32.totalorder %s720_s17, 2 }
   0xf   : > { %s803_s26 = scalar_select %p38_p7, %s708_s14, %s40_s21  }
  0x10   : > { %s948_s25 = scalar_select %p798_p9, 1, 0 }
  0x11   : > { %p805_p11 = por %p127_p10, %p53_p3  ;;  %s153_s28 = sand.u32 1, %s708_s14  }
  0x12   : > { %s520_s29 = sshll.u32 %s153_s28, 3  ;;  %s539_s30 = sshll.u32 %s716_s16, 7 }
  0x13   : > { %s949_s27 = scalar_select %p805_p11, 1, 0 }
  0x14   : > { %s816_s6 = scalar_lea.hbm %s941_s0, %s539_s30  ;;  %s157_s7 = scalar_lea.vmem [#allocation2], %s520_s29 }
  0x15   : > { %s167_s8 = sshll.u32 %s157_s7, 4  ;;  %p822_p0 = pnand %p553_p13, %p788_p4  ;;  %s818_s8 = int_to_ptr.vmem [resolvable:$true] %s167_s8 }
  0x16   : > { %s154_s10 = scalar_lea.sflag [#allocation3], %s153_s28  ;;  %s608_s11 = scalar_lea.hbm %s816_s6, 128 }
  0x17   : > { %p609_p3 = scmp.ne.s32.totalorder %s816_s6, %s608_s11  ;;  %p610_p5 = pneg %p822_p0 }
  0x18   : > { %s613_s21 = scalar_lea.hbm %s941_s0, 256  ;;  %p614_p4 = scmp.lt.u32.totalorder %s816_s6, %s941_s0 }
  0x19   : > { %p611_p6 = pnand %p610_p5, %p609_p3  ;;  %p615_p10 = scmp.lt.u32.totalorder %s613_s21, %s608_s11 }
  0x1a   : > { %p617_p12 = scmp.lt.u32.totalorder %s608_s11, %s816_s6 }
  0x1b   : > { %p612_p7 = pneg %p611_p6  ;;  %p616_p13 = por %p615_p10, %p614_p4 }
  0x1d   : > { %p618_p1 = por %p617_p12, %p616_p13 }
  0x1f   : > { %p619_p2 = pnand %p618_p1, %p612_p7 }
  0x21   : > { %622 = shalt.err (!%p619_p2)
}
  0x22   : > { %s623_s28 = scalar_lea.vmem %s818_s8, 128  ;;  %s722_s29 = smov [#allocation2]  }
  0x23   : > { %p624_p3 = scmp.ne.s32.totalorder %s818_s8, %s623_s28  ;;  %s628_s30 = sshll.u32 %s722_s29, 4  ;;  %s629_s30 = int_to_ptr.vmem [resolvable:$false] %s628_s30 }
  0x24   : > { %s630_s4 = scalar_lea.vmem %s629_s30, 256  ;;  %p631_p9 = scmp.lt.s32.totalorder %s818_s8, %s629_s30 }
  0x25   : > { %p626_p6 = pnand %p624_p3, %p610_p5  ;;  %p632_p4 = scmp.lt.s32.totalorder %s630_s4, %s623_s28 }
  0x27   : > { %p627_p11 = pneg %p626_p6  ;;  %p633_p10 = por %p632_p4, %p631_p9 }
  0x29   : > { %p634_p12 = pnand %p633_p10, %p627_p11 }
  0x2b   : > { %637 = shalt.err (!%p634_p12)
}
  0x2c   : > { %548 = dma.hbm_to_vmem [thread:$0]  (!%p822_p0), %s816_s6, 128, %s818_s8, %s154_s10  }
  0x2d   : > { %p951_p1 = scmp.lt.s32.totalorder %s720_s17, 3  ;;  %p952_p2 = scmp.ge.s32.totalorder %s720_s17, 1 }
  0x2f   : > { %p173_p5 = pnand %p952_p2, %p951_p1 }
  0x30   : > { %s858_s5 = sand.u32 (!%p173_p5), 1, %s704_s13  }
  0x31   : > { %176 = sbr.rel (%p173_p5) target bundleno = 522 (0x20a), region = 32  ;;  %s524_s7 = sshll.u32 (!%p173_p5), %s858_s5, 3 }
  0x32   : > { %s179_s11 = scalar_lea.sflag (!%p173_p5), [#allocation3], %s858_s5  ;;  %s182_s9 = scalar_lea.vmem (!%p173_p5), [#allocation2], %s524_s7 }
  0x38   : > { %691 = dma.done.wait (%p794_p8), %s179_s11, 128  }
  0x39   : > { %693 = vsyncadd (%p794_p8), %s179_s11, 4294967168  ;;  %v723_v0 = vmov 0.0   ;;  %v724_v1 = vmov 0   ;;  %v207_v2 = vld [vmem:[%s182_s9] sm:$0xff]  ;;  %vm215_vm0 = vcmask 1043456   ;;  %vm211_vm1 = vcmask 31744  }
  0x3a   : > { %284 = vmatprep.mubr.f32.mxu0 %v723_v0  ;;  %606 = vset.pattern.permute.xlu0 %v724_v1  ;;  %v296_v3 = vld [vmem:[%s943_s2] sm:$0xf]  ;;  %v210_v4 = vcombine.high %v207_v2, %v207_v2  ;;  %v533_v6 = vld [vmem:[%s943_s2 + $0x4] sm:$0xf]  ;;  %v725_v7 = vmov 839922192   ;;  %v304_v9 = vlaneseq }
  0x3b   : > { %386 = vmatprep.mubr.f32.mxu1 %v723_v0  ;;  %299 = vperm.xlu0 %606, %v296_v3   ;;  %v208_v5 = vld [vmem:[%s942_s1] sm:$0xf]  ;;  %v302_v8 = vunpack.c.l.s4 %v725_v7  ;;  %v529_v22 = vld [vmem:[%s942_s1 + $0x4] sm:$0xf]  ;;  %s540_s23 = sshll.u32 %s712_s15, 7  ;;  %s204_s28 = scalar_lea.vmem [#allocation5], %s524_s7 }
  0x3c   : > { %526 = vmatprep.subr.msk.mxu0 %vm215_vm0, %v210_v4  ;;  %v305_v11 = vshrl.u32 %v304_v9, 7  ;;  %s432_s29 = sshll.u32 %s204_s28, 4  ;;  %s892_s11 = scalar_lea.hbm %s944_s3, %s540_s23  ;;  %s894_s29 = int_to_ptr.vmem [resolvable:$true] %s432_s29 }
  0x3d   : > { %527 = vmatpush1.msk.msra.mxu0 %vm215_vm0, %v207_v2  ;;  %v303_v10 = vunpack.c.0.s8 %v302_v8  ;;  %s416_s9 = scalar_lea.sflag [#allocation4], %s858_s5  ;;  %s638_s6 = scalar_lea.vmem %s894_s29, 128 }
  0x3e   : > { %528 = vmatmul.mubr.msk.f32.vlgmr.msra.gmra.mrb[0].mxu0 %vm211_vm1, %v208_v5  ;;  %p639_p8 = scmp.ne.s32.totalorder %s894_s29, %s638_s6  ;;  %p953_p9 = scmp.ne.s32.totalorder %s948_s25, 0 }
  0x3f   : > { %402 = vperm.xlu0 %606, %v533_v6   ;;  %v306_v12 = vsub.s32 %v303_v10, %v305_v11  ;;  %s726_s15 = smov [#allocation5]  }
  0x40   : > { %p640_p11 = pnand %p639_p8, %p953_p9  ;;  %s642_s7 = sshll.u32 %s726_s15, 4  ;;  %s643_s7 = int_to_ptr.vmem [resolvable:$false] %s642_s7 }
  0x41   : > { %s644_s8 = scalar_lea.vmem %s643_s7, 256  ;;  %p645_p7 = scmp.lt.s32.totalorder %s894_s29, %s643_s7 }
  0x42   : > { %p641_p0 = pneg %p640_p11  ;;  %p646_p13 = scmp.lt.s32.totalorder %s644_s8, %s638_s6 }
  0x44   : > { %p647_p3 = por %p646_p13, %p645_p7 }
  0x46   : > { %p648_p6 = pnand %p647_p3, %p641_p0 }
  0xba   : > { %v300_v14 = vpop.permute.xlu0 %299 }
  0xbb   : > { %v307_v16 = vrot.slane %v300_v14, %v306_v12 }
  0xbe   : > { %v403_v24 = vpop.permute.xlu0 %402 }
  0xbf   : > { %v410_v27 = vrot.slane %v403_v24, %v306_v12 }
 0x111   : > { %v286_v13 = vpop.f32.mrb[0].mxu0 }
 0x112   : > { %v288_v15 = vpop.f32.mrb[1].mxu0 }
 0x113   : > { %v293_v17 = vcombine.low %v286_v13, %v288_v15 }
 0x115   : > { %v295_v18 = vadd.f32 %v293_v17, %v207_v2 }
 0x117   : > { %v309_v19 = vadd.f32 %v307_v16, %v295_v18 }
 0x119   : > { %v310_v20 = vmax.f32 %v309_v19, 0.0 }
 0x11b   : > { %v314_v21 = vcombine.high %v310_v20, %v310_v20 }
 0x11d   : > { %530 = vmatprep.subr.msk.mxu1 %vm215_vm0, %v314_v21 }
 0x11e   : > { %531 = vmatpush1.msk.msra.mxu1 %vm215_vm0, %v310_v20 }
 0x11f   : > { %532 = vmatmul.mubr.msk.f32.vlgmr.msra.gmra.mrb[0].mxu1 %vm211_vm1, %v529_v22 }
 0x1f2   : > { %v388_v23 = vpop.f32.mrb[0].mxu1 }
 0x1f3   : > { %v390_v25 = vpop.f32.mrb[1].mxu1 }
 0x1f4   : > { %v395_v26 = vcombine.low %v388_v23, %v390_v25 }
 0x1f6   : > { %v397_v28 = vadd.f32 %v395_v26, %v310_v20 }
 0x1f8   : > { %v412_v29 = vadd.f32 %v410_v27, %v397_v28 }
 0x1fa   : > { %v413_v30 = vmax.f32 %v412_v29, 0.0 }
 0x1fc   : > { %414 = vst [vmem:[%s204_s28] sm:$0xff] %v413_v30 }
 0x1fd   : > { %651 = shalt.err (!%p648_p6)
}
 0x1fe   : > { %s652_s5 = scalar_lea.hbm %s892_s11, 128  ;;  %s656_s24 = scalar_lea.hbm %s944_s3, 256 }
 0x1ff   : > { %p653_p4 = scmp.ne.s32.totalorder %s892_s11, %s652_s5  ;;  %p657_p1 = scmp.lt.u32.totalorder %s892_s11, %s944_s3 }
 0x200   : > { %p658_p2 = scmp.lt.u32.totalorder %s656_s24, %s652_s5  ;;  %p660_p8 = scmp.lt.u32.totalorder %s652_s5, %s892_s11 }
 0x201   : > { %p654_p10 = pnand %p653_p4, %p953_p9 }
 0x202   : > { %p659_p5 = por %p658_p2, %p657_p1 }
 0x203   : > { %p655_p12 = pneg %p654_p10 }
 0x204   : > { %p661_p11 = por %p660_p8, %p659_p5 }
 0x206   : > { %p662_p0 = pnand %p661_p11, %p655_p12 }
 0x208   : > { %665 = shalt.err (!%p662_p0)
}
 0x209   : > { %543 = dma.vmem_to_hbm [thread:$0]  (%p953_p9), %s894_s29, 128, %s892_s11, %s416_s9  }
 0x20a PF: > { %s444_s22 = sand.u32 1, %s700_s12   ;;  %p954_p7 = scmp.ne.s32.totalorder %s949_s27, 0 }
 0x20b   : > { %p955_p13 = scmp.ge.s32.totalorder %s720_s17, 2  ;;  %s445_s23 = scalar_lea.sflag [#allocation4], %s444_s22 }
 0x20d   : > { %p550_p3 = pnand %p955_p13, %p954_p7 }
 0x20f   : > { %695 = dma.done.wait (!%p550_p3), %s445_s23, 128  }
 0x210   : > { %697 = vsyncadd (!%p550_p3), %s445_s23, 4294967168  ;;  %s19_s17 = sadd.s32 1, %s720_s17   ;;  %s956_s12 = smov %s704_s13 }
 0x211   : > { %p16_p6 = scmp.ge.s32.totalorder %s19_s17, 4   ;;  %s957_s13 = smov %s708_s14 }
 0x212   : > { %s958_s14 = smov %s803_s26  ;;  %s959_s15 = smov %s716_s16 }
 0x213   : > { %s960_s16 = smov %s962_s20  ;;  %18 = sbr.rel (!%p16_p6) target bundleno = 6 (0x6), region = 79 }
 0x21a   :  { %450 = vsyncpa [#allocation3], 1 }
 0x21b   :  { %452 = vsyncpa [#allocation3 + $0x1], 1 }
 0x21c   :  { %453 = vsyncpa [#allocation4], 1 }
 0x21d   :  { %455 = vsyncpa [#allocation4 + $0x1], 1 }

</bundles_post_ra>
